<compile_context>
chip_gen: v7x
topology: tpu7x:2x2x1
jax: 0.10.0
libtpu: 0.0.40
codegen_flags: <defaults>
</compile_context>

<pallas_src>
import math

import jax
import jax.numpy as jnp
from jax import lax
from jax.experimental import pallas as pl
from jax.experimental.pallas import tpu as pltpu


def _round_up(x, m):
    return ((x + m - 1) // m) * m


def _mlp_kernel(x_ref, w1_ref, b1_ref, w2_ref, b2_ref, w3_ref, b3_ref, o_ref):
    # x_ref: (TB, F) batch tile. Activations are kept feature-major
    # ([features, TB]) so the batch dim sits on the 128-lane axis: bias add,
    # ReLU and the final store are fully lane-dense.
    x = x_ref[...]

    # Layer 1: h1 = W1 @ x^T -> (64, TB). NT-form dot_general: contraction on
    # the MXU with f32 accumulation, no in-kernel transpose.
    h1 = lax.dot_general(
        w1_ref[...], x,
        dimension_numbers=(((1,), (1,)), ((), ())),
        preferred_element_type=jnp.float32,
    )
    h1 = jnp.maximum(h1 + b1_ref[...], 0.0)  # dropout == identity (eval mode)

    # Layer 2: (32, 64) @ (64, TB) -> (32, TB)
    h2 = jnp.dot(w2_ref[...], h1, preferred_element_type=jnp.float32)
    h2 = jnp.maximum(h2 + b2_ref[...], 0.0)

    # Layer 3: (C, 32) @ (32, TB) -> (C, TB), no activation.
    out = jnp.dot(w3_ref[...], h2, preferred_element_type=jnp.float32)
    o_ref[...] = (out + b3_ref[...]).astype(o_ref.dtype)


def specific_model_forward(x, w1, b1, w2, b2, w3, b3, *, block_b=1024):
    """Fused 3-layer MLP forward pass, batch-tiled over a 1-D grid.

    x:  [B, F]
    w1: [64, F],  b1: [64, 1]   (PyTorch [out, in] weight layout)
    w2: [32, 64], b2: [32, 1]
    w3: [C, 32],  b3: [C, 1]
    returns [B, C] float32
    """
    B, F = x.shape
    C = w3.shape[0]

    # Batch tile: multiple of 128 (lane width) so activations and the output
    # store are lane-dense; capped at block_b. Working set at TB=1024 is a few
    # hundred KiB even double-buffered -> safe under v7x's 32 MiB scoped VMEM.
    TB = min(block_b, _round_up(B, 128))
    Bp = _round_up(B, TB)
    if Bp != B:
        x = jnp.pad(x, ((0, Bp - B), (0, 0)))

    grid = (Bp // TB,)
    const = lambda shape: pl.BlockSpec(shape, lambda i: (0, 0))  # VMEM-resident

    out_cb = pl.pallas_call(
        _mlp_kernel,
        out_shape=jax.ShapeDtypeStruct((C, Bp), jnp.float32),
        grid=grid,
        in_specs=[
            pl.BlockSpec((TB, F), lambda i: (i, 0)),   # x tile, pipelined
            const(w1.shape), const(b1.shape),
            const(w2.shape), const(b2.shape),
            const(w3.shape), const(b3.shape),
        ],
        out_specs=pl.BlockSpec((C, TB), lambda i: (0, i)),
        compiler_params=pltpu.CompilerParams(
            dimension_semantics=("parallel",),         # shard batch over 2 TCs on v7x
        ),
    )(x, w1, b1, w2, b2, w3, b3)

    # [C, Bp] -> [B, C]; tiny XLA transpose outside the kernel keeps the
    # kernel-side store unmasked/lane-dense.
    return out_cb.T[:B]


def init_linear_params(key, fan_in, fan_out):
    """PyTorch-style nn.Linear init: U(-1/sqrt(fan_in), 1/sqrt(fan_in)).

    Weights in PyTorch [out, in] layout; bias as [out, 1] column so it
    broadcasts along the lane (batch) axis inside the kernel.
    """
    kw, kb = jax.random.split(key)
    bound = 1.0 / math.sqrt(fan_in)
    w = jax.random.uniform(kw, (fan_out, fan_in), jnp.float32, -bound, bound)
    b = jax.random.uniform(kb, (fan_out, 1), jnp.float32, -bound, bound)
    return w, b


if __name__ == "__main__":
    # params = {'num_specific_features': 16, 'num_specific_classes': 4}
    num_specific_features = 16
    specific_hidden_size = 64
    specific_mid_size = 32
    num_specific_classes = 4
    batch = 8

    key = jax.random.PRNGKey(0)
    kx, k1, k2, k3 = jax.random.split(key, 4)

    x = jax.random.normal(kx, (batch, num_specific_features), jnp.float32)

    w1, b1 = init_linear_params(k1, num_specific_features, specific_hidden_size)
    w2, b2 = init_linear_params(k2, specific_hidden_size, specific_mid_size)
    w3, b3 = init_linear_params(k3, specific_mid_size, num_specific_classes)

    out = specific_model_forward(x, w1, b1, w2, b2, w3, b3)
    out = jax.block_until_ready(out)

    # Pure-JAX reference (same semantics as the PyTorch forward in eval mode).
    hp = lax.Precision.HIGHEST
    ref = jnp.maximum(jnp.dot(x, w1.T, precision=hp) + b1[:, 0], 0.0)
    ref = jnp.maximum(jnp.dot(ref, w2.T, precision=hp) + b2[:, 0], 0.0)
    ref = jnp.dot(ref, w3.T, precision=hp) + b3[:, 0]

    assert out.shape == (batch, num_specific_classes)
    assert jnp.allclose(out, ref, atol=1e-4, rtol=1e-4), float(
        jnp.max(jnp.abs(out - ref))
    )

    print("KERNEL_OK")
</pallas_src>

<mosaic_0001>
module attributes {stable_mosaic.version = 11 : i64} {
  func.func @_mlp_kernel(%arg0: i32, %arg1: memref<128x16xf32, #tpu.memory_space<vmem>>, %arg2: memref<64x16xf32, #tpu.memory_space<vmem>>, %arg3: memref<64x1xf32, #tpu.memory_space<vmem>>, %arg4: memref<32x64xf32, #tpu.memory_space<vmem>>, %arg5: memref<32x1xf32, #tpu.memory_space<vmem>>, %arg6: memref<4x32xf32, #tpu.memory_space<vmem>>, %arg7: memref<4x1xf32, #tpu.memory_space<vmem>>, %arg8: memref<4x128xf32, #tpu.memory_space<vmem>>) attributes {dimension_semantics = [#tpu.dimension_semantics<parallel>], iteration_bounds = array<i64: 1>, scalar_prefetch = 0 : i64, scratch_operands = 0 : i64, tpu.core_type = #tpu.core_type<tc>, window_params = [{transform_indices = @transform_0, window_bounds = array<i64: 128, 16>}, {pipeline_mode = #tpu.pipeline_mode<synchronous>, transform_indices = @transform_1, window_bounds = array<i64: 64, 16>}, {pipeline_mode = #tpu.pipeline_mode<synchronous>, transform_indices = @transform_2, window_bounds = array<i64: 64, 1>}, {pipeline_mode = #tpu.pipeline_mode<synchronous>, transform_indices = @transform_3, window_bounds = array<i64: 32, 64>}, {pipeline_mode = #tpu.pipeline_mode<synchronous>, transform_indices = @transform_4, window_bounds = array<i64: 32, 1>}, {pipeline_mode = #tpu.pipeline_mode<synchronous>, transform_indices = @transform_5, window_bounds = array<i64: 4, 32>}, {pipeline_mode = #tpu.pipeline_mode<synchronous>, transform_indices = @transform_6, window_bounds = array<i64: 4, 1>}, {transform_indices = @transform_7, window_bounds = array<i64: 4, 128>}]} {
    %c0 = arith.constant 0 : index
    %c0_0 = arith.constant 0 : index
    %0 = vector.load %arg1[%c0, %c0_0] : memref<128x16xf32, #tpu.memory_space<vmem>>, vector<128x16xf32>
    %c0_1 = arith.constant 0 : index
    %c0_2 = arith.constant 0 : index
    %1 = vector.load %arg2[%c0_1, %c0_2] : memref<64x16xf32, #tpu.memory_space<vmem>>, vector<64x16xf32>
    %cst = arith.constant dense<0.000000e+00> : vector<64x128xf32>
    %2 = tpu.matmul %1, %0, %cst {dimension_numbers = #tpu.dot_dimension_numbers<[1], [1], [0], [0], [0, 0, 1, 0], [], []>} : vector<64x16xf32>, vector<128x16xf32>, vector<64x128xf32> -> vector<64x128xf32>
    %c0_3 = arith.constant 0 : index
    %c0_4 = arith.constant 0 : index
    %3 = vector.load %arg3[%c0_3, %c0_4] : memref<64x1xf32, #tpu.memory_space<vmem>>, vector<64x1xf32>
    %4 = vector.broadcast %3 : vector<64x1xf32> to vector<64x128xf32>
    %5 = arith.addf %2, %4 : vector<64x128xf32>
    %cst_5 = arith.constant 0.000000e+00 : f32
    %6 = vector.broadcast %cst_5 : f32 to vector<64x128xf32>
    %7 = arith.maximumf %5, %6 : vector<64x128xf32>
    %c0_6 = arith.constant 0 : index
    %c0_7 = arith.constant 0 : index
    %8 = vector.load %arg4[%c0_6, %c0_7] : memref<32x64xf32, #tpu.memory_space<vmem>>, vector<32x64xf32>
    %cst_8 = arith.constant dense<0.000000e+00> : vector<32x128xf32>
    %9 = tpu.matmul %8, %7, %cst_8 {dimension_numbers = #tpu.dot_dimension_numbers<[1], [0], [0], [1], [0, 0, 1, 1], [], []>} : vector<32x64xf32>, vector<64x128xf32>, vector<32x128xf32> -> vector<32x128xf32>
    %c0_9 = arith.constant 0 : index
    %c0_10 = arith.constant 0 : index
    %10 = vector.load %arg5[%c0_9, %c0_10] : memref<32x1xf32, #tpu.memory_space<vmem>>, vector<32x1xf32>
    %11 = vector.broadcast %10 : vector<32x1xf32> to vector<32x128xf32>
    %12 = arith.addf %9, %11 : vector<32x128xf32>
    %cst_11 = arith.constant 0.000000e+00 : f32
    %13 = vector.broadcast %cst_11 : f32 to vector<32x128xf32>
    %14 = arith.maximumf %12, %13 : vector<32x128xf32>
    %c0_12 = arith.constant 0 : index
    %c0_13 = arith.constant 0 : index
    %15 = vector.load %arg6[%c0_12, %c0_13] : memref<4x32xf32, #tpu.memory_space<vmem>>, vector<4x32xf32>
    %cst_14 = arith.constant dense<0.000000e+00> : vector<4x128xf32>
    %16 = tpu.matmul %15, %14, %cst_14 {dimension_numbers = #tpu.dot_dimension_numbers<[1], [0], [0], [1], [0, 0, 1, 1], [], []>} : vector<4x32xf32>, vector<32x128xf32>, vector<4x128xf32> -> vector<4x128xf32>
    %c0_15 = arith.constant 0 : index
    %c0_16 = arith.constant 0 : index
    %17 = vector.load %arg7[%c0_15, %c0_16] : memref<4x1xf32, #tpu.memory_space<vmem>>, vector<4x1xf32>
    %18 = vector.broadcast %17 : vector<4x1xf32> to vector<4x128xf32>
    %19 = arith.addf %16, %18 : vector<4x128xf32>
    %c0_17 = arith.constant 0 : index
    %c0_18 = arith.constant 0 : index
    %20 = vector.load %arg8[%c0_17, %c0_18] : memref<4x128xf32, #tpu.memory_space<vmem>>, vector<4x128xf32>
    tpu.vector_store %arg8[%c0_17, %c0_18], %19 {strides = array<i32>} : memref<4x128xf32, #tpu.memory_space<vmem>>, vector<4x128xf32>,
    return
  }
  func.func @transform_0(%arg0: i32) -> (i32, i32) {
    %c0_i32 = arith.constant 0 : i32
    %c0_i32_0 = arith.constant 0 : i32
    return %arg0, %c0_i32 : i32, i32
  }
  func.func @transform_1(%arg0: i32) -> (i32, i32) {
    %c0_i32 = arith.constant 0 : i32
    %c0_i32_0 = arith.constant 0 : i32
    %c0_i32_1 = arith.constant 0 : i32
    return %c0_i32, %c0_i32_0 : i32, i32
  }
  func.func @transform_2(%arg0: i32) -> (i32, i32) {
    %c0_i32 = arith.constant 0 : i32
    %c0_i32_0 = arith.constant 0 : i32
    %c0_i32_1 = arith.constant 0 : i32
    return %c0_i32, %c0_i32_0 : i32, i32
  }
  func.func @transform_3(%arg0: i32) -> (i32, i32) {
    %c0_i32 = arith.constant 0 : i32
    %c0_i32_0 = arith.constant 0 : i32
    %c0_i32_1 = arith.constant 0 : i32
    return %c0_i32, %c0_i32_0 : i32, i32
  }
  func.func @transform_4(%arg0: i32) -> (i32, i32) {
    %c0_i32 = arith.constant 0 : i32
    %c0_i32_0 = arith.constant 0 : i32
    %c0_i32_1 = arith.constant 0 : i32
    return %c0_i32, %c0_i32_0 : i32, i32
  }
  func.func @transform_5(%arg0: i32) -> (i32, i32) {
    %c0_i32 = arith.constant 0 : i32
    %c0_i32_0 = arith.constant 0 : i32
    %c0_i32_1 = arith.constant 0 : i32
    return %c0_i32, %c0_i32_0 : i32, i32
  }
  func.func @transform_6(%arg0: i32) -> (i32, i32) {
    %c0_i32 = arith.constant 0 : i32
    %c0_i32_0 = arith.constant 0 : i32
    %c0_i32_1 = arith.constant 0 : i32
    return %c0_i32, %c0_i32_0 : i32, i32
  }
  func.func @transform_7(%arg0: i32) -> (i32, i32) {
    %c0_i32 = arith.constant 0 : i32
    %c0_i32_0 = arith.constant 0 : i32
    return %c0_i32, %arg0 : i32, i32
  }
}

</mosaic_0001>

<bundles_post_ra>
// kernel: tpu_custom_call.1
= control target key start
LH: loop header
LB: loop body
LE: loop exit
PB: predicated region body
PF: predicated region fallthrough
CT: control target
= control target key end

     0   :  { %vm99_vm0 = vcmask 130048   ;;  %v759_v6 = vmov 0   ;;  %s992_s0 = inlined_call_operand.vmem [shape: f32[128,16], index: 0, kind: input, shape index: {}]   ;;  %s993_s1 = inlined_call_operand.vmem [shape: f32[64,16], index: 1, kind: input, shape index: {}]   ;;  %s994_s2 = inlined_call_operand.vmem [shape: f32[64,1], index: 2, kind: input, shape index: {}]   ;;  %s995_s3 = inlined_call_operand.vmem [shape: f32[32,64], index: 3, kind: input, shape index: {}]   ;;  %s996_s4 = inlined_call_operand.vmem [shape: f32[32,1], index: 4, kind: input, shape index: {}]   ;;  %s997_s5 = inlined_call_operand.vmem [shape: f32[4,32], index: 5, kind: input, shape index: {}]   ;;  %s998_s6 = inlined_call_operand.vmem [shape: f32[4,1], index: 6, kind: input, shape index: {}]   ;;  %s999_s7 = inlined_call_operand.hbm [shape: f32[4,128], index: 7, kind: output, shape index: {}]  }
   0x1   :  { %v27_v0 = vld [vmem:[%s992_s0] sm:$0xff]  ;;  %v28_v1 = vld [vmem:[%s992_s0 + $0x8] sm:$0xff]  ;;  %v29_v2 = vld [vmem:[%s992_s0 + $0x10] sm:$0xff]  ;;  %733 = vset.pattern.permute.xlu0 %v759_v6  ;;  %734 = vset.pattern.permute.xlu1 %v759_v6 }
   0x2   :  { %v658_v3 = vpack.c.bf16 %v28_v1, %v27_v0  ;;  %vm815_vm1 = vmpackc.low %vm99_vm0, %vm99_vm0  ;;  %v30_v5 = vld [vmem:[%s992_s0 + $0x18] sm:$0xff]  ;;  %v43_v8 = vld [vmem:[%s993_s1] sm:$0xff] }
   0x3   :  { %v664_v7 = vpack.c.bf16 %v30_v5, %v29_v2  ;;  %v31_v9 = vld [vmem:[%s992_s0 + $0x20] sm:$0xff]  ;;  %v32_v10 = vld [vmem:[%s992_s0 + $0x28] sm:$0xff]  ;;  %613 = vmatprep.mubr.msk.f32.mxu0 %vm99_vm0, %v43_v8  ;;  %v53_v13 = vld [vmem:[%s994_s2 + $0x10] sm:$0xff] }
   0x4   :  { %660 = vmatprep.subr.msk.bf16.mxu0 %vm815_vm1, %v658_v3  ;;  %v51_v11 = vld [vmem:[%s994_s2] sm:$0xff]  ;;  %v670_v12 = vpack.c.bf16 %v32_v10, %v31_v9  ;;  %v52_v14 = vld [vmem:[%s994_s2 + $0x8] sm:$0xff]  ;;  %71 = vperm.xlu1 %734, %v53_v13   ;;  %v54_v15 = vld [vmem:[%s994_s2 + $0x18] sm:$0xff] }
   0x5   :  { %663 = vmatpush3.bf16.xpose.msk.msra.mxu0 %vm815_vm1, %v658_v3  ;;  %61 = vperm.xlu0 %733, %v51_v11  }
   0x6   :  { %666 = vmatprep.subr.msk.bf16.mxu0 %vm815_vm1, %v664_v7 }
   0xd   :  { %669 = vmatpush3.bf16.xpose.msk.msra.mxu0 %vm815_vm1, %v664_v7 }
   0xe   :  { %12 = vsyncpa [#allocation3], 0  ;;  %672 = vmatprep.subr.msk.bf16.mxu0 %vm815_vm1, %v670_v12  ;;  %66 = vperm.xlu0 %733, %v52_v14   ;;  %v33_v16 = vld [vmem:[%s992_s0 + $0x30] sm:$0xff]  ;;  %v34_v17 = vld [vmem:[%s992_s0 + $0x38] sm:$0xff]  ;;  %vm313_vm2 = vcmask 523264   ;;  %vm761_vm3 = vmmov 0  }
   0xf   :  { %v55_v18 = vld [vmem:[%s994_s2 + $0x20] sm:$0xff]  ;;  %76 = vperm.xlu1 %734, %v54_v15   ;;  %v56_v19 = vld [vmem:[%s994_s2 + $0x28] sm:$0xff]  ;;  %v676_v20 = vpack.c.bf16 %v34_v17, %v33_v16  ;;  %v57_v21 = vld [vmem:[%s994_s2 + $0x30] sm:$0xff]  ;;  %vm422_vm4 = vcmask 261120   ;;  %s763_s8 = smov [#allocation2]  }
  0x10   :  { %v58_v22 = vld [vmem:[%s994_s2 + $0x38] sm:$0xff]  ;;  %v35_v23 = vld [vmem:[%s992_s0 + $0x40] sm:$0xff]  ;;  %v36_v24 = vld [vmem:[%s992_s0 + $0x48] sm:$0xff] }
  0x11   :  { %v289_v25 = vld [vmem:[%s996_s4] sm:$0xff]  ;;  %v290_v26 = vld [vmem:[%s996_s4 + $0x8] sm:$0xff]  ;;  %v682_v27 = vpack.c.bf16 %v36_v24, %v35_v23  ;;  %v291_v28 = vld [vmem:[%s996_s4 + $0x10] sm:$0xff]  ;;  %v760_v23 = vmov 0.0|0.0   ;;  %v762_v24 = vmov 0.0  }
  0x12   :  { %81 = vperm.xlu0 %733, %v55_v18   ;;  %v292_v29 = vld [vmem:[%s996_s4 + $0x18] sm:$0xff]  ;;  %v37_v30 = vld [vmem:[%s992_s0 + $0x50] sm:$0xff]  ;;  %v416_v32 = vld [vmem:[%s998_s6] sm:$0xf]  ;;  %s503_s6 = sshll.u32 %s763_s8, 4  ;;  %s504_s6 = int_to_ptr.vmem [resolvable:$true] %s503_s6 }
  0x13   :  { %86 = vperm.xlu1 %734, %v56_v19   ;;  %v38_v31 = vld [vmem:[%s992_s0 + $0x58] sm:$0xff]  ;;  %v39_v34 = vld [vmem:[%s992_s0 + $0x60] sm:$0xff]  ;;  %v40_v35 = vld [vmem:[%s992_s0 + $0x68] sm:$0xff]  ;;  %s735_s9 = scalar_lea.vmem %s504_s6, 64  ;;  %p740_p1 = scmp.lt.s32.totalorder %s504_s6, %s504_s6 }
  0x14   :  { %v688_v33 = vpack.c.bf16 %v38_v31, %v37_v30  ;;  %v694_v36 = vpack.c.bf16 %v40_v35, %v39_v34  ;;  %v41_v37 = vld [vmem:[%s992_s0 + $0x70] sm:$0xff]  ;;  %v42_v38 = vld [vmem:[%s992_s0 + $0x78] sm:$0xff]  ;;  %v44_v40 = vld [vmem:[%s993_s1 + $0x8] sm:$0xff]  ;;  %p736_p0 = scmp.ne.s32.totalorder %s504_s6, %s735_s9  ;;  %p741_p2 = scmp.lt.s32.totalorder %s735_s9, %s735_s9 }
  0x15   :  { %675 = vmatpush3.bf16.xpose.msk.msra.mxu0 %vm815_vm1, %v670_v12  ;;  %v700_v39 = vpack.c.bf16 %v42_v38, %v41_v37  ;;  %v45_v41 = vld [vmem:[%s993_s1 + $0x10] sm:$0xff]  ;;  %v46_v42 = vld [vmem:[%s993_s1 + $0x18] sm:$0xff]  ;;  %v47_v43 = vld [vmem:[%s993_s1 + $0x20] sm:$0xff] }
  0x16   :  { %678 = vmatprep.subr.msk.bf16.mxu0 %vm815_vm1, %v676_v20  ;;  %91 = vperm.xlu0 %733, %v57_v21   ;;  %v48_v44 = vld [vmem:[%s993_s1 + $0x28] sm:$0xff]  ;;  %v49_v45 = vld [vmem:[%s993_s1 + $0x30] sm:$0xff]  ;;  %v50_v46 = vld [vmem:[%s993_s1 + $0x38] sm:$0xff]  ;;  %p742_p3 = por %p741_p2, %p740_p1 }
  0x17   :  { %96 = vperm.xlu1 %734, %v58_v22   ;;  %v285_v47 = vld [vmem:[%s995_s3] sm:$0xff]  ;;  %v287_v21 = vld [vmem:[%s995_s3 + $0x10] sm:$0xff]  ;;  %v288_v22 = vld [vmem:[%s995_s3 + $0x18] sm:$0xff] }
  0x18   :  { %641 = vmatprep.mubr.msk.f32.mxu1 %vm313_vm2, %v285_v47  ;;  %p743_p4 = pnand %p742_p3, %p736_p0 }
  0x1a   :  { %295 = vperm.xlu0 %733, %v289_v25  }
  0x1b   :  { %300 = vperm.xlu1 %734, %v290_v26  }
  0x1d   :  { %681 = vmatpush3.bf16.xpose.msk.msra.mxu0 %vm815_vm1, %v676_v20  ;;  %v286_v20 = vld [vmem:[%s995_s3 + $0x8] sm:$0xff] }
  0x1e   :  { %684 = vmatprep.subr.msk.bf16.mxu0 %vm815_vm1, %v682_v27  ;;  %305 = vperm.xlu0 %733, %v291_v28  }
  0x1f   :  { %310 = vperm.xlu1 %734, %v292_v29  }
  0x22   :  { %419 = vperm.xlu0 %733, %v416_v32  }
  0x25   :  { %687 = vmatpush3.bf16.xpose.msk.msra.mxu0 %vm815_vm1, %v682_v27 }
  0x26   :  { %690 = vmatprep.subr.msk.bf16.mxu0 %vm815_vm1, %v688_v33 }
  0x2d   :  { %693 = vmatpush3.bf16.xpose.msk.msra.mxu0 %vm815_vm1, %v688_v33 }
  0x2e   :  { %696 = vmatprep.subr.msk.bf16.mxu0 %vm815_vm1, %v694_v36 }
  0x35   :  { %699 = vmatpush3.bf16.xpose.msk.msra.mxu0 %vm815_vm1, %v694_v36 }
  0x36   :  { %702 = vmatprep.subr.msk.bf16.mxu0 %vm815_vm1, %v700_v39 }
  0x3d   :  { %705 = vmatpush3.bf16.xpose.msk.msra.mxu0 %vm815_vm1, %v700_v39 }
  0x44   :  { %614 = vmatmul.mubr.msk.f32.vlgmr.msra.gmra.mrb[0].mxu0 %vm99_vm0, %v44_v40 }
  0x45   :  { %616 = vmatprep.mubr.msk.f32.mxu0 %vm99_vm0, %v45_v41 }
  0x48   :  { %617 = vmatmul.mubr.msk.f32.gmra.mrb[2].mxu0 %vm99_vm0, %v46_v42 }
  0x49   :  { %619 = vmatprep.mubr.msk.f32.mxu0 %vm99_vm0, %v47_v43  ;;  %v415_v43 = vld [vmem:[%s997_s5] sm:$0xf] }
  0x4c   :  { %620 = vmatmul.mubr.msk.f32.gmra.mrb[4].mxu0 %vm99_vm0, %v48_v44 }
  0x4d   :  { %622 = vmatprep.mubr.msk.f32.mxu0 %vm99_vm0, %v49_v45 }
  0x50   :  { %623 = vmatmul.mubr.msk.f32.gmra.mrb[6].mxu0 %vm99_vm0, %v50_v46 }
  0x83   :  { %v72_v49 = vpop.permute.xlu1 %71 }
  0x84   :  { %v62_v48 = vpop.permute.xlu0 %61 }
  0x8d   :  { %v67_v50 = vpop.permute.xlu0 %66 }
  0x8e   :  { %v77_v51 = vpop.permute.xlu1 %76 }
  0x91   :  { %v82_v0 = vpop.permute.xlu0 %81 }
  0x92   :  { %v87_v61 = vpop.permute.xlu1 %86 }
  0x95   :  { %v92_v12 = vpop.permute.xlu0 %91 }
  0x96   :  { %v97_v9 = vpop.permute.xlu1 %96 }
  0x99   :  { %v296_v26 = vpop.permute.xlu0 %295 }
  0x9a   :  { %v301_v25 = vpop.permute.xlu1 %300 }
  0x9d   :  { %v306_v35 = vpop.permute.xlu0 %305 }
  0x9e   :  { %v311_v32 = vpop.permute.xlu1 %310 }
  0xa1   :  { %v420_v44 = vpop.permute.xlu0 %419 }
 0x117   :  { %v615_v52 = vpop.f32.mrb[0].mxu0 }
 0x118   :  { %v244_v53 = vadd.f32 %v615_v52, %v67_v50  ;;  %v238_v54 = vpop.f32.mrb[1].mxu0 }
 0x119   :  { %v239_v55 = vadd.f32 %v238_v54, %v62_v48 }
 0x11a   :  { %v278_v56 = vmax.f32 %v244_v53, 0.0 }
 0x11b   :  { %v277_v57 = vmax.f32 %v239_v55, 0.0  ;;  %v618_v58 = vpop.f32.mrb[2].mxu0 }
 0x11c   :  { %v254_v59 = vadd.f32 %v618_v58, %v77_v51  ;;  %v248_v60 = vpop.f32.mrb[3].mxu0 }
 0x11d   :  { %v249_v62 = vadd.f32 %v248_v60, %v72_v49  ;;  %v706_v63 = vpack.c.bf16 %v278_v56, %v277_v57 }
 0x11e   :  { %v280_v1 = vmax.f32 %v254_v59, 0.0 }
 0x11f   :  { %v279_v2 = vmax.f32 %v249_v62, 0.0  ;;  %v621_v3 = vpop.f32.mrb[4].mxu0  ;;  %707 = vmatprep.subr.bf16.mxu1 %v706_v63 }
 0x120   :  { %v264_v4 = vadd.f32 %v621_v3, %v87_v61  ;;  %v258_v5 = vpop.f32.mrb[5].mxu0  ;;  %709 = vmatpush3.bf16.msra.mxu1 %v706_v63 }
 0x121   :  { %v710_v6 = vpack.c.bf16 %v280_v1, %v279_v2  ;;  %v259_v7 = vadd.f32 %v258_v5, %v82_v0 }
 0x122   :  { %v282_v8 = vmax.f32 %v264_v4, 0.0 }
 0x123   :  { %v281_v10 = vmax.f32 %v259_v7, 0.0  ;;  %v624_v11 = vpop.f32.mrb[6].mxu0  ;;  %711 = vmatprep.subr.bf16.mxu1 %v710_v6 }
 0x124   :  { %v274_v13 = vadd.f32 %v624_v11, %v97_v9  ;;  %v268_v14 = vpop.f32.mrb[7].mxu0  ;;  %713 = vmatpush3.bf16.msra.mxu1 %v710_v6 }
 0x125   :  { %v714_v15 = vpack.c.bf16 %v282_v8, %v281_v10  ;;  %v269_v16 = vadd.f32 %v268_v14, %v92_v12 }
 0x126   :  { %v284_v17 = vmax.f32 %v274_v13, 0.0 }
 0x127   :  { %v283_v18 = vmax.f32 %v269_v16, 0.0  ;;  %715 = vmatprep.subr.bf16.mxu1 %v714_v15 }
 0x128   :  { %717 = vmatpush3.bf16.msra.mxu1 %v714_v15 }
 0x129   :  { %v718_v19 = vpack.c.bf16 %v284_v17, %v283_v18 }
 0x12b   :  { %719 = vmatprep.subr.bf16.mxu1 %v718_v19 }
 0x12c   :  { %721 = vmatpush3.bf16.msra.mxu1 %v718_v19 }
 0x12d   :  { %722 = vmatprep.subr.bf16.mxu1 %v760_v23 }
 0x12f   :  { %642 = vmatmul.mubr.msk.f32.vlgmr.msra.gmra.mrb[0].mxu1 %vm313_vm2, %v286_v20 }
 0x130   :  { %644 = vmatprep.mubr.msk.f32.mxu1 %vm313_vm2, %v287_v21 }
 0x133   :  { %645 = vmatmul.mubr.msk.f32.gmra.mrb[2].mxu1 %vm313_vm2, %v288_v22 }
 0x134   :  { %655 = vmatprep.mubr.msk.f32.mxu1 %vm761_vm3, %v762_v24 }
 0x202   :  { %v643_v27 = vpop.f32.mrb[0].mxu1 }
 0x203   :  { %v398_v28 = vadd.f32 %v643_v27, %v301_v25  ;;  %v392_v29 = vpop.f32.mrb[1].mxu1 }
 0x204   :  { %v393_v30 = vadd.f32 %v392_v29, %v296_v26 }
 0x205   :  { %v412_v31 = vmax.f32 %v398_v28, 0.0 }
 0x206   :  { %v411_v33 = vmax.f32 %v393_v30, 0.0  ;;  %v646_v34 = vpop.f32.mrb[2].mxu1 }
 0x207   :  { %v408_v36 = vadd.f32 %v646_v34, %v311_v32  ;;  %v402_v37 = vpop.f32.mrb[3].mxu1 }
 0x208   :  { %v723_v38 = vpack.c.bf16 %v412_v31, %v411_v33  ;;  %v403_v39 = vadd.f32 %v402_v37, %v306_v35 }
 0x209   :  { %v414_v40 = vmax.f32 %v408_v36, 0.0 }
 0x20a   :  { %v413_v41 = vmax.f32 %v403_v39, 0.0  ;;  %724 = vmatpush3.bf16.msra.mxu1 %v723_v38 }
 0x20b   :  { %725 = vmatprep.subr.bf16.mxu1 %v760_v23 }
 0x20c   :  { %v726_v42 = vpack.c.bf16 %v414_v40, %v413_v41 }
 0x20e   :  { %727 = vmatpush3.bf16.msra.mxu1 %v726_v42 }
 0x211   :  { %656 = vmatmul.mubr.msk.f32.vlgmr.msra.gmra.mrb[4].mxu1 %vm422_vm4, %v415_v43 }
 0x2e4   :  { %v492_v45 = vpop.f32.mrb[4].mxu1 }
 0x2e5   :  { %v493_v46 = vadd.f32 %v492_v45, %v420_v44  ;;  %v657_v47 = vpop.f32.mrb[5].mxu1 }
 0x2e7   :  { %496 = vst [vmem:[#allocation2] sm:$0xf] %v493_v46 }
 0x2e8   :  { %746 = shalt.err (!%p743_p4)
}
 0x2e9   :  { %s747_s5 = scalar_lea.hbm %s999_s7, 64 }
 0x2ea   :  { %p748_p5 = scmp.ne.s32.totalorder %s999_s7, %s747_s5  ;;  %p751_p6 = scmp.lt.u32.totalorder %s747_s5, %s999_s7 }
 0x2ec   :  { %p753_p7 = pnand %p751_p6, %p748_p5 }
 0x2ee   :  { %756 = shalt.err (!%p753_p7)
}
 0x2ef   :  { %506 = dma.vmem_to_hbm [thread:$0]  %s504_s6, 64, %s999_s7, [#allocation3]  }
 0x2f0   :  { %757 = dma.done.wait [#allocation3], 64  }
 0x2f1   :  { %758 = vsyncadd [#allocation3], 4294967232 }
 0x2f2   :  { %510 = vsyncpa [#allocation3], 1 }

</bundles_post_ra>
